<compile_context>
chip_gen: v5e
topology: v5e:2x2
jax: 0.10.0
libtpu: 0.0.40
codegen_flags: <defaults>
</compile_context>

<pallas_src>
import functools

import jax
import jax.numpy as jnp
from jax.experimental import pallas as pl
from jax.experimental.pallas import tpu as pltpu

# ---------------------------------------------------------------------------
# Model hyper-parameters (consistent with the PyTorch module defaults)
# ---------------------------------------------------------------------------
UNITS = 32
THETAS_DIM = 8
NUM_BLOCK_LAYERS = 4
BACKCAST_LENGTH = 10
FORECAST_LENGTH = 5
BATCH = 8

LANE = 128     # lane width of the packed parameter slab / fused output
WROWS = 128    # padded K-rows per weight block in the slab
BROWS = 8      # padded rows per bias block in the slab
HEAD_WIDTH = BACKCAST_LENGTH + FORECAST_LENGTH  # 15 real output columns


def _round_up(x, m):
    return (x + m - 1) // m * m


def _slab_layout(num_block_layers):
    """Static row offsets of every parameter inside the packed slab."""
    offs = {}
    row = 0
    for i in range(num_block_layers):
        offs[f"w{i}"] = row
        row += WROWS
        offs[f"b{i}"] = row
        row += BROWS
    offs["wt"] = row          # fused [theta_b | theta_f] projection
    row += WROWS
    offs["wh"] = row          # fused block-diagonal [backcast ; forecast] head
    row += WROWS
    offs["bh"] = row          # fused head bias
    row += BROWS
    return offs, row


# ---------------------------------------------------------------------------
# Kernel
# ---------------------------------------------------------------------------
def _nbeats_fused_kernel(offs, num_block_layers, x_ref, p_ref, out_ref):
    """Whole block forward on one batch tile; all params live in one VMEM slab.

    Every weight is zero-padded to (128, 128) inside the slab, so all hidden
    activations are kept at full 128-lane width (extra columns are exact zeros
    because padded weights/biases are exact zeros and relu(0)=0).  Zero padding
    is free on the MXU (it pads K/N to the tile anyway) and keeps every vector
    load/store lane-dense and unmasked.
    """
    f32 = jnp.float32
    cd = p_ref.dtype                      # compute dtype of the MXU inputs (f32 or bf16)

    h = x_ref[...]                        # (TB, BACKCAST_LENGTH)

    # ---- fc stack: Linear -> ReLU, repeated num_block_layers times ----------
    # layer 0: K = backcast_length (static slice of the padded weight block)
    w0 = p_ref[offs["w0"]:offs["w0"] + BACKCAST_LENGTH, :]          # (10, 128)
    b0 = p_ref[offs["b0"]:offs["b0"] + 1, :].astype(f32)            # (1, 128)
    h = jnp.maximum(
        jnp.dot(h.astype(cd), w0, preferred_element_type=f32) + b0, 0.0
    )                                                                # (TB, 128) f32

    for i in range(1, num_block_layers):
        w = p_ref[offs[f"w{i}"]:offs[f"w{i}"] + WROWS, :]            # (128, 128)
        b = p_ref[offs[f"b{i}"]:offs[f"b{i}"] + 1, :].astype(f32)    # (1, 128)
        h = jnp.maximum(
            jnp.dot(h.astype(cd), w, preferred_element_type=f32) + b, 0.0
        )

    # ---- fused theta projection: [theta_b | theta_f] = relu(h @ [Wtb|Wtf]) ---
    wt = p_ref[offs["wt"]:offs["wt"] + WROWS, :]                     # (128, 128)
    theta = jnp.maximum(
        jnp.dot(h.astype(cd), wt, preferred_element_type=f32), 0.0
    )                                                                # (TB, 128) f32

    # ---- fused block-diagonal head: [backcast | forecast] -------------------
    wh = p_ref[offs["wh"]:offs["wh"] + WROWS, :]                     # (128, 128)
    bh = p_ref[offs["bh"]:offs["bh"] + 1, :].astype(f32)             # (1, 128)
    out = jnp.dot(theta.astype(cd), wh, preferred_element_type=f32) + bh

    out_ref[...] = out.astype(out_ref.dtype)                         # lane-dense store


# ---------------------------------------------------------------------------
# Wrapper
# ---------------------------------------------------------------------------
def nbeats_generic_block(x, params_slab, *, block_batch=512):
    """Runs the fused block.  Returns (backcast, forecast) in f32.

    x:           (batch, BACKCAST_LENGTH), f32 or bf16.
    params_slab: packed parameter slab from `pack_params`, f32 or bf16.
    """
    batch = x.shape[0]
    offs, slab_rows = _slab_layout(NUM_BLOCK_LAYERS)
    assert params_slab.shape == (slab_rows, LANE)

    # Batch tile: multiple of 8 sublanes, capped at block_batch; pad batch to a
    # whole number of tiles (padded rows are sliced off after the call).
    tb = _round_up(min(block_batch, _round_up(batch, 8)), 8)
    padded = _round_up(batch, tb)
    if padded != batch:
        x = jnp.pad(x, ((0, padded - batch), (0, 0)))
    grid = (padded // tb,)

    kernel = functools.partial(_nbeats_fused_kernel, offs, NUM_BLOCK_LAYERS)

    out = pl.pallas_call(
        kernel,
        out_shape=jax.ShapeDtypeStruct((padded, LANE), jnp.float32),
        grid=grid,
        in_specs=[
            # x: tiled over batch
            pl.BlockSpec((tb, BACKCAST_LENGTH), lambda i: (i, 0)),
            # packed params: one full-array block, constant index -> fetched
            # once and kept VMEM-resident across all grid steps.
            pl.BlockSpec((slab_rows, LANE), lambda i: (0, 0)),
        ],
        out_specs=pl.BlockSpec((tb, LANE), lambda i: (i, 0)),
        compiler_params=pltpu.CompilerParams(
            dimension_semantics=("parallel",),   # shard batch axis across TCs on v7x
        ),
    )(x, params_slab)

    backcast = out[:batch, :BACKCAST_LENGTH]
    forecast = out[:batch, BACKCAST_LENGTH:BACKCAST_LENGTH + FORECAST_LENGTH]
    return backcast, forecast


# ---------------------------------------------------------------------------
# Parameter construction / packing
# ---------------------------------------------------------------------------
def init_params(key):
    """Deterministic synthetic parameters matching the PyTorch module shapes.

    PyTorch nn.Linear stores weight as (out, in); here weights are kept as
    (in, out) so the math is `h @ W + b`.
    """
    keys = jax.random.split(key, 2 * NUM_BLOCK_LAYERS + 6)
    k_iter = iter(keys)

    def lin(kw, in_f, out_f, scale=0.1):
        return scale * jax.random.normal(kw, (in_f, out_f), dtype=jnp.float32)

    fc = []
    w0 = lin(next(k_iter), BACKCAST_LENGTH, UNITS)
    b0 = 0.1 * jax.random.normal(next(k_iter), (1, UNITS), dtype=jnp.float32)
    fc.append((w0, b0))
    for _ in range(NUM_BLOCK_LAYERS - 1):
        w = lin(next(k_iter), UNITS, UNITS)
        b = 0.1 * jax.random.normal(next(k_iter), (1, UNITS), dtype=jnp.float32)
        fc.append((w, b))

    theta_b_w = lin(next(k_iter), UNITS, THETAS_DIM)       # bias=False
    theta_f_w = lin(next(k_iter), UNITS, THETAS_DIM)       # bias=False
    backcast_w = lin(next(k_iter), THETAS_DIM, BACKCAST_LENGTH)
    backcast_b = 0.1 * jax.random.normal(
        next(k_iter), (1, BACKCAST_LENGTH), dtype=jnp.float32)
    forecast_w = lin(next(k_iter), THETAS_DIM, FORECAST_LENGTH)
    forecast_b = 0.1 * jax.random.normal(
        next(k_iter), (1, FORECAST_LENGTH), dtype=jnp.float32)

    return {
        "fc": fc,
        "theta_b_w": theta_b_w,
        "theta_f_w": theta_f_w,
        "backcast_w": backcast_w,
        "backcast_b": backcast_b,
        "forecast_w": forecast_w,
        "forecast_b": forecast_b,
    }


def pack_params(params):
    """Pack every parameter into one zero-padded (rows, 128) f32 slab.

    The theta projections are fused column-wise ([Wtb | Wtf]); the heads are
    fused into an exact block-diagonal weight [[Wb, 0], [0, Wf]] plus the
    concatenated bias [bb | bf].  All padding is exact zeros so the fused
    outputs are bit-identical to the separate heads.
    """
    offs, rows = _slab_layout(NUM_BLOCK_LAYERS)
    slab = jnp.zeros((rows, LANE), dtype=jnp.float32)

    for i, (w, b) in enumerate(params["fc"]):
        slab = slab.at[offs[f"w{i}"]:offs[f"w{i}"] + w.shape[0], :w.shape[1]].set(w)
        slab = slab.at[offs[f"b{i}"]:offs[f"b{i}"] + 1, :b.shape[1]].set(
            b.reshape(1, -1))

    wt = jnp.concatenate([params["theta_b_w"], params["theta_f_w"]], axis=1)
    slab = slab.at[offs["wt"]:offs["wt"] + UNITS, :2 * THETAS_DIM].set(wt)

    wh = jnp.zeros((2 * THETAS_DIM, HEAD_WIDTH), dtype=jnp.float32)
    wh = wh.at[:THETAS_DIM, :BACKCAST_LENGTH].set(params["backcast_w"])
    wh = wh.at[THETAS_DIM:, BACKCAST_LENGTH:].set(params["forecast_w"])
    slab = slab.at[offs["wh"]:offs["wh"] + 2 * THETAS_DIM, :HEAD_WIDTH].set(wh)

    bh = jnp.concatenate(
        [params["backcast_b"].reshape(1, -1), params["forecast_b"].reshape(1, -1)],
        axis=1)
    slab = slab.at[offs["bh"]:offs["bh"] + 1, :HEAD_WIDTH].set(bh)
    return slab


# ---------------------------------------------------------------------------
# Pure-JAX reference (matches the PyTorch forward in eval mode)
# ---------------------------------------------------------------------------
def reference_forward(x, params):
    h = x
    for w, b in params["fc"]:
        h = jnp.maximum(h @ w + b, 0.0)
    tb = jnp.maximum(h @ params["theta_b_w"], 0.0)
    tf_ = jnp.maximum(h @ params["theta_f_w"], 0.0)
    backcast = tb @ params["backcast_w"] + params["backcast_b"]
    forecast = tf_ @ params["forecast_w"] + params["forecast_b"]
    return backcast, forecast


if __name__ == "__main__":
    key = jax.random.PRNGKey(0)
    k_param, k_x, k_x2 = jax.random.split(key, 3)

    params = init_params(k_param)
    slab = pack_params(params)

    # --- test 1: f32, single tile ------------------------------------------
    x = jax.random.normal(k_x, (BATCH, BACKCAST_LENGTH), dtype=jnp.float32)
    backcast, forecast = nbeats_generic_block(x, slab)
    backcast, forecast = jax.block_until_ready((backcast, forecast))
    ref_backcast, ref_forecast = reference_forward(x, params)

    assert backcast.shape == (BATCH, BACKCAST_LENGTH)
    assert forecast.shape == (BATCH, FORECAST_LENGTH)
    assert jnp.allclose(backcast, ref_backcast, atol=1e-4, rtol=1e-4)
    assert jnp.allclose(forecast, ref_forecast, atol=1e-4, rtol=1e-4)

    # --- test 2: f32, multi-step batch grid (3 tiles of 8 rows) -------------
    x2 = jax.random.normal(k_x2, (24, BACKCAST_LENGTH), dtype=jnp.float32)
    bc2, fc2 = nbeats_generic_block(x2, slab, block_batch=8)
    bc2, fc2 = jax.block_until_ready((bc2, fc2))
    ref_bc2, ref_fc2 = reference_forward(x2, params)
    assert jnp.allclose(bc2, ref_bc2, atol=1e-4, rtol=1e-4)
    assert jnp.allclose(fc2, ref_fc2, atol=1e-4, rtol=1e-4)

    # --- test 3: bf16 MXU-input path (f32 accumulation), loose tolerance ----
    bc3, fc3 = nbeats_generic_block(
        x.astype(jnp.bfloat16), slab.astype(jnp.bfloat16))
    bc3, fc3 = jax.block_until_ready((bc3, fc3))
    assert jnp.allclose(bc3, ref_backcast, atol=5e-2, rtol=1e-1)
    assert jnp.allclose(fc3, ref_forecast, atol=5e-2, rtol=1e-1)

    print("KERNEL_OK")
</pallas_src>

<mosaic_0001>
module attributes {stable_mosaic.version = 11 : i64} {
  func.func @_nbeats_fused_kernel(%arg0: i32, %arg1: memref<8x10xf32, #tpu.memory_space<vmem>>, %arg2: memref<808x128xf32, #tpu.memory_space<vmem>>, %arg3: memref<8x128xf32, #tpu.memory_space<vmem>>) attributes {dimension_semantics = [#tpu.dimension_semantics<parallel>], iteration_bounds = array<i64: 1>, scalar_prefetch = 0 : i64, scratch_operands = 0 : i64, tpu.core_type = #tpu.core_type<tc>, window_params = [{transform_indices = @transform_0, window_bounds = array<i64: 8, 10>}, {pipeline_mode = #tpu.pipeline_mode<synchronous>, transform_indices = @transform_1, window_bounds = array<i64: 808, 128>}, {transform_indices = @transform_2, window_bounds = array<i64: 8, 128>}]} {
    %c0 = arith.constant 0 : index
    %c0_0 = arith.constant 0 : index
    %0 = vector.load %arg1[%c0, %c0_0] : memref<8x10xf32, #tpu.memory_space<vmem>>, vector<8x10xf32>
    %c0_1 = arith.constant 0 : index
    %c0_2 = arith.constant 0 : index
    %1 = vector.load %arg2[%c0_1, %c0_2] : memref<808x128xf32, #tpu.memory_space<vmem>>, vector<10x128xf32>
    %c128 = arith.constant 128 : index
    %c0_3 = arith.constant 0 : index
    %2 = vector.load %arg2[%c128, %c0_3] : memref<808x128xf32, #tpu.memory_space<vmem>>, vector<1x128xf32>
    %cst = arith.constant dense<0.000000e+00> : vector<8x128xf32>
    %3 = tpu.matmul %0, %1, %cst {dimension_numbers = #tpu.dot_dimension_numbers<[1], [0], [0], [1], [0, 0, 1, 1], [], []>} : vector<8x10xf32>, vector<10x128xf32>, vector<8x128xf32> -> vector<8x128xf32>
    %4 = vector.broadcast %2 : vector<1x128xf32> to vector<8x128xf32>
    %5 = arith.addf %3, %4 : vector<8x128xf32>
    %cst_4 = arith.constant 0.000000e+00 : f32
    %6 = vector.broadcast %cst_4 : f32 to vector<8x128xf32>
    %7 = arith.maximumf %5, %6 : vector<8x128xf32>
    %c136 = arith.constant 136 : index
    %c0_5 = arith.constant 0 : index
    %8 = vector.load %arg2[%c136, %c0_5] : memref<808x128xf32, #tpu.memory_space<vmem>>, vector<128x128xf32>
    %c264 = arith.constant 264 : index
    %c0_6 = arith.constant 0 : index
    %9 = vector.load %arg2[%c264, %c0_6] : memref<808x128xf32, #tpu.memory_space<vmem>>, vector<1x128xf32>
    %cst_7 = arith.constant dense<0.000000e+00> : vector<8x128xf32>
    %10 = tpu.matmul %7, %8, %cst_7 {dimension_numbers = #tpu.dot_dimension_numbers<[1], [0], [0], [1], [0, 0, 1, 1], [], []>} : vector<8x128xf32>, vector<128x128xf32>, vector<8x128xf32> -> vector<8x128xf32>
    %11 = vector.broadcast %9 : vector<1x128xf32> to vector<8x128xf32>
    %12 = arith.addf %10, %11 : vector<8x128xf32>
    %cst_8 = arith.constant 0.000000e+00 : f32
    %13 = vector.broadcast %cst_8 : f32 to vector<8x128xf32>
    %14 = arith.maximumf %12, %13 : vector<8x128xf32>
    %c272 = arith.constant 272 : index
    %c0_9 = arith.constant 0 : index
    %15 = vector.load %arg2[%c272, %c0_9] : memref<808x128xf32, #tpu.memory_space<vmem>>, vector<128x128xf32>
    %c400 = arith.constant 400 : index
    %c0_10 = arith.constant 0 : index
    %16 = vector.load %arg2[%c400, %c0_10] : memref<808x128xf32, #tpu.memory_space<vmem>>, vector<1x128xf32>
    %cst_11 = arith.constant dense<0.000000e+00> : vector<8x128xf32>
    %17 = tpu.matmul %14, %15, %cst_11 {dimension_numbers = #tpu.dot_dimension_numbers<[1], [0], [0], [1], [0, 0, 1, 1], [], []>} : vector<8x128xf32>, vector<128x128xf32>, vector<8x128xf32> -> vector<8x128xf32>
    %18 = vector.broadcast %16 : vector<1x128xf32> to vector<8x128xf32>
    %19 = arith.addf %17, %18 : vector<8x128xf32>
    %cst_12 = arith.constant 0.000000e+00 : f32
    %20 = vector.broadcast %cst_12 : f32 to vector<8x128xf32>
    %21 = arith.maximumf %19, %20 : vector<8x128xf32>
    %c408 = arith.constant 408 : index
    %c0_13 = arith.constant 0 : index
    %22 = vector.load %arg2[%c408, %c0_13] : memref<808x128xf32, #tpu.memory_space<vmem>>, vector<128x128xf32>
    %c536 = arith.constant 536 : index
    %c0_14 = arith.constant 0 : index
    %23 = vector.load %arg2[%c536, %c0_14] : memref<808x128xf32, #tpu.memory_space<vmem>>, vector<1x128xf32>
    %cst_15 = arith.constant dense<0.000000e+00> : vector<8x128xf32>
    %24 = tpu.matmul %21, %22, %cst_15 {dimension_numbers = #tpu.dot_dimension_numbers<[1], [0], [0], [1], [0, 0, 1, 1], [], []>} : vector<8x128xf32>, vector<128x128xf32>, vector<8x128xf32> -> vector<8x128xf32>
    %25 = vector.broadcast %23 : vector<1x128xf32> to vector<8x128xf32>
    %26 = arith.addf %24, %25 : vector<8x128xf32>
    %cst_16 = arith.constant 0.000000e+00 : f32
    %27 = vector.broadcast %cst_16 : f32 to vector<8x128xf32>
    %28 = arith.maximumf %26, %27 : vector<8x128xf32>
    %c544 = arith.constant 544 : index
    %c0_17 = arith.constant 0 : index
    %29 = vector.load %arg2[%c544, %c0_17] : memref<808x128xf32, #tpu.memory_space<vmem>>, vector<128x128xf32>
    %cst_18 = arith.constant dense<0.000000e+00> : vector<8x128xf32>
    %30 = tpu.matmul %28, %29, %cst_18 {dimension_numbers = #tpu.dot_dimension_numbers<[1], [0], [0], [1], [0, 0, 1, 1], [], []>} : vector<8x128xf32>, vector<128x128xf32>, vector<8x128xf32> -> vector<8x128xf32>
    %cst_19 = arith.constant 0.000000e+00 : f32
    %31 = vector.broadcast %cst_19 : f32 to vector<8x128xf32>
    %32 = arith.maximumf %30, %31 : vector<8x128xf32>
    %c672 = arith.constant 672 : index
    %c0_20 = arith.constant 0 : index
    %33 = vector.load %arg2[%c672, %c0_20] : memref<808x128xf32, #tpu.memory_space<vmem>>, vector<128x128xf32>
    %c800 = arith.constant 800 : index
    %c0_21 = arith.constant 0 : index
    %34 = vector.load %arg2[%c800, %c0_21] : memref<808x128xf32, #tpu.memory_space<vmem>>, vector<1x128xf32>
    %cst_22 = arith.constant dense<0.000000e+00> : vector<8x128xf32>
    %35 = tpu.matmul %32, %33, %cst_22 {dimension_numbers = #tpu.dot_dimension_numbers<[1], [0], [0], [1], [0, 0, 1, 1], [], []>} : vector<8x128xf32>, vector<128x128xf32>, vector<8x128xf32> -> vector<8x128xf32>
    %36 = vector.broadcast %34 : vector<1x128xf32> to vector<8x128xf32>
    %37 = arith.addf %35, %36 : vector<8x128xf32>
    %c0_23 = arith.constant 0 : index
    %c0_24 = arith.constant 0 : index
    %38 = vector.load %arg3[%c0_23, %c0_24] : memref<8x128xf32, #tpu.memory_space<vmem>>, vector<8x128xf32>
    tpu.vector_store %arg3[%c0_23, %c0_24], %37 {strides = array<i32>} : memref<8x128xf32, #tpu.memory_space<vmem>>, vector<8x128xf32>,
    return
  }
  func.func @transform_0(%arg0: i32) -> (i32, i32) {
    %c0_i32 = arith.constant 0 : i32
    %c0_i32_0 = arith.constant 0 : i32
    return %arg0, %c0_i32 : i32, i32
  }
  func.func @transform_1(%arg0: i32) -> (i32, i32) {
    %c0_i32 = arith.constant 0 : i32
    %c0_i32_0 = arith.constant 0 : i32
    %c0_i32_1 = arith.constant 0 : i32
    return %c0_i32, %c0_i32_0 : i32, i32
  }
  func.func @transform_2(%arg0: i32) -> (i32, i32) {
    %c0_i32 = arith.constant 0 : i32
    %c0_i32_0 = arith.constant 0 : i32
    return %arg0, %c0_i32 : i32, i32
  }
}

</mosaic_0001>

<bundles_post_ra>
// kernel: tpu_custom_call.1
= control target key start
LH: loop header
LB: loop body
LE: loop exit
PB: predicated region body
PF: predicated region fallthrough
CT: control target
= control target key end

     0   :  { %7 = vsyncpa [#allocation3], 0  ;;  %s406_s0 = inlined_call_operand.hbm [shape: f32[8,10], index: 0, kind: input, shape index: {}]   ;;  %s407_s1 = inlined_call_operand.hbm [shape: f32[808,128], index: 1, kind: input, shape index: {}]   ;;  %s408_s2 = inlined_call_operand.hbm [shape: f32[8,128], index: 2, kind: output, shape index: {}]  }
   0x1   :  { %8 = vsyncpa [#allocation6], 0 }
   0x2   :  { %9 = vsyncpa [#allocation4], 0  ;;  %s15_s11 = sshll.u32 %s406_s0, 4  ;;  %s377_s12 = smov [#allocation2]   ;;  %s16_s11 = int_to_ptr.hbm [resolvable:$true] %s15_s11 }
   0x3   :  { %s17_s13 = sshll.u32 %s377_s12, 4  ;;  %s25_s16 = sshll.u32 %s407_s1, 4  ;;  %s18_s13 = int_to_ptr.vmem [resolvable:$true] %s17_s13  ;;  %s26_s16 = int_to_ptr.hbm [resolvable:$true] %s25_s16 }
   0x4   :  { %20 = dma.hbm_to_vmem [thread:$0]  %s16_s11, 128, %s18_s13, [#allocation3]  }
   0x5   :  { %s378_s17 = smov [#allocation5]   ;;  %s379_s19 = smov 128  }
   0x6   :  { %s27_s18 = sshll.u32 %s378_s17, 4  ;;  %s380_s20 = smov 8   ;;  %s28_s18 = int_to_ptr.vmem [resolvable:$true] %s27_s18 }
   0x7   :  { %33 = dma.hbm_to_vmem [thread:$0]  %s26_s16, 12928, %s28_s18, [#allocation6], %s379_s19, %s379_s19, %s380_s20  }
   0x8   :  { %371 = dma.done.wait [#allocation3], 128  }
   0x9   :  { %372 = vsyncadd [#allocation3], 4294967168 }
   0xa   :  { %373 = dma.done.wait [#allocation6], 12928  }
   0xb   :  { %374 = vsyncadd [#allocation6], 4294954368  ;;  %vm51_vm0 = vcmask 1041408   ;;  %v44_v0 = vld [vmem:[#allocation5 + $0x8] sm:$0x3]  ;;  %v43_v1 = vld [vmem:[#allocation5] sm:$0xff] }
   0xc   :  { %287 = vmatpush.msk.msra.mxu0 %vm51_vm0, %v44_v0  ;;  %v42_v2 = vld [vmem:[#allocation2] sm:$0xff]  ;;  %vm47_vm1 = vcmask 80896   ;;  %v91_v3 = vld [vmem:[#allocation5 + $0x100] sm:$0xff]  ;;  %v89_v5 = vld [vmem:[#allocation5 + $0xf0] sm:$0xff]  ;;  %s381_s0 = smov [#allocation7]   ;;  %s276_s23 = sshll.u32 %s408_s2, 4  ;;  %s277_s23 = int_to_ptr.hbm [resolvable:$true] %s276_s23 }
   0xd   :  { %v90_v4 = vld [vmem:[#allocation5 + $0xf8] sm:$0xff]  ;;  %94 = vmatpush.msra.mxu1 %v91_v3  ;;  %v88_v6 = vld [vmem:[#allocation5 + $0xe8] sm:$0xff]  ;;  %v87_v7 = vld [vmem:[#allocation5 + $0xe0] sm:$0xff]  ;;  %s274_s1 = sshll.u32 %s381_s0, 4  ;;  %s275_s1 = int_to_ptr.vmem [resolvable:$true] %s274_s1 }
   0xe   :  { %70 = vmatpush.msra.mxu0 %v43_v1  ;;  %v86_v8 = vld [vmem:[#allocation5 + $0xd8] sm:$0xff]  ;;  %v85_v9 = vld [vmem:[#allocation5 + $0xd0] sm:$0xff]  ;;  %v84_v10 = vld [vmem:[#allocation5 + $0xc8] sm:$0xff] }
   0xf   :  { %288 = vmatmul.msk.f32.vlgmr.msra.gmra.mxu0 %vm47_vm1, %v42_v2  ;;  %95 = vmatpush.msra.mxu1 %v90_v4  ;;  %v83_v11 = vld [vmem:[#allocation5 + $0xc0] sm:$0xff]  ;;  %v82_v12 = vld [vmem:[#allocation5 + $0xb8] sm:$0xff]  ;;  %v81_v13 = vld [vmem:[#allocation5 + $0xb0] sm:$0xff] }
  0x10   :  { %v80_v14 = vld [vmem:[#allocation5 + $0xa8] sm:$0xff]  ;;  %v79_v15 = vld [vmem:[#allocation5 + $0xa0] sm:$0xff]  ;;  %v78_v16 = vld [vmem:[#allocation5 + $0x98] sm:$0xff] }
  0x11   :  { %96 = vmatpush.msra.mxu1 %v89_v5  ;;  %v77_v17 = vld [vmem:[#allocation5 + $0x90] sm:$0xff]  ;;  %v76_v18 = vld [vmem:[#allocation5 + $0x88] sm:$0xff]  ;;  %v129_v20 = vld [vmem:[#allocation5 + $0x180] sm:$0xff] }
  0x12   :  { %v130_v19 = vld [vmem:[#allocation5 + $0x188] sm:$0xff]  ;;  %v128_v21 = vld [vmem:[#allocation5 + $0x178] sm:$0xff]  ;;  %v127_v22 = vld [vmem:[#allocation5 + $0x170] sm:$0xff] }
  0x13   :  { %97 = vmatpush.msra.mxu1 %v88_v6  ;;  %133 = vmatpush.msra.mxu2 %v130_v19  ;;  %v126_v23 = vld [vmem:[#allocation5 + $0x168] sm:$0xff]  ;;  %v125_v24 = vld [vmem:[#allocation5 + $0x160] sm:$0xff]  ;;  %v124_v25 = vld [vmem:[#allocation5 + $0x158] sm:$0xff] }
  0x14   :  { %v123_v26 = vld [vmem:[#allocation5 + $0x150] sm:$0xff]  ;;  %v122_v27 = vld [vmem:[#allocation5 + $0x148] sm:$0xff]  ;;  %v121_v28 = vld [vmem:[#allocation5 + $0x140] sm:$0xff] }
  0x15   :  { %98 = vmatpush.msra.mxu1 %v87_v7  ;;  %134 = vmatpush.msra.mxu2 %v129_v20  ;;  %v120_v29 = vld [vmem:[#allocation5 + $0x138] sm:$0xff]  ;;  %v119_v30 = vld [vmem:[#allocation5 + $0x130] sm:$0xff]  ;;  %v118_v31 = vld [vmem:[#allocation5 + $0x128] sm:$0xff] }
  0x16   :  { %v294_v32 = vld [vmem:[#allocation5 + $0x80] ss:$0 sm:$0xff]  ;;  %v116_v37 = vld [vmem:[#allocation5 + $0x118] sm:$0xff]  ;;  %v115_v38 = vld [vmem:[#allocation5 + $0x110] sm:$0xff] }
  0x17   :  { %99 = vmatpush.msra.mxu1 %v86_v8  ;;  %135 = vmatpush.msra.mxu2 %v128_v21  ;;  %v117_v36 = vld [vmem:[#allocation5 + $0x120] sm:$0xff]  ;;  %v169_v39 = vld [vmem:[#allocation5 + $0x210] sm:$0xff]  ;;  %v168_v40 = vld [vmem:[#allocation5 + $0x208] sm:$0xff] }
  0x18   :  { %172 = vmatpush.msra.mxu3 %v169_v39  ;;  %v167_v41 = vld [vmem:[#allocation5 + $0x200] sm:$0xff]  ;;  %v166_v42 = vld [vmem:[#allocation5 + $0x1f8] sm:$0xff]  ;;  %v165_v43 = vld [vmem:[#allocation5 + $0x1f0] sm:$0xff] }
  0x19   :  { %100 = vmatpush.msra.mxu1 %v85_v9  ;;  %136 = vmatpush.msra.mxu2 %v127_v22  ;;  %v164_v44 = vld [vmem:[#allocation5 + $0x1e8] sm:$0xff]  ;;  %v163_v45 = vld [vmem:[#allocation5 + $0x1e0] sm:$0xff]  ;;  %v162_v46 = vld [vmem:[#allocation5 + $0x1d8] sm:$0xff] }
  0x1a   :  { %173 = vmatpush.msra.mxu3 %v168_v40  ;;  %v161_v47 = vld [vmem:[#allocation5 + $0x1d0] sm:$0xff]  ;;  %v160_v48 = vld [vmem:[#allocation5 + $0x1c8] sm:$0xff]  ;;  %v159_v49 = vld [vmem:[#allocation5 + $0x1c0] sm:$0xff] }
  0x1b   :  { %101 = vmatpush.msra.mxu1 %v84_v10  ;;  %137 = vmatpush.msra.mxu2 %v126_v23  ;;  %v158_v50 = vld [vmem:[#allocation5 + $0x1b8] sm:$0xff]  ;;  %v157_v51 = vld [vmem:[#allocation5 + $0x1b0] sm:$0xff]  ;;  %v295_v52 = vld [vmem:[#allocation5 + $0x108] ss:$0 sm:$0xff] }
  0x1c   :  { %174 = vmatpush.msra.mxu3 %v167_v41  ;;  %v156_v56 = vld [vmem:[#allocation5 + $0x1a8] sm:$0xff]  ;;  %v155_v57 = vld [vmem:[#allocation5 + $0x1a0] sm:$0xff]  ;;  %v154_v58 = vld [vmem:[#allocation5 + $0x198] sm:$0xff] }
  0x1d   :  { %102 = vmatpush.msra.mxu1 %v83_v11  ;;  %138 = vmatpush.msra.mxu2 %v125_v24  ;;  %v208_v59 = vld [vmem:[#allocation5 + $0x298] sm:$0xff]  ;;  %v207_v60 = vld [vmem:[#allocation5 + $0x290] sm:$0xff]  ;;  %v206_v61 = vld [vmem:[#allocation5 + $0x288] sm:$0xff] }
  0x1e   :  { %175 = vmatpush.msra.mxu3 %v166_v42  ;;  %209 = vmatpush.msrb.mxu0 %v208_v59  ;;  %v205_v62 = vld [vmem:[#allocation5 + $0x280] sm:$0xff]  ;;  %v204_v63 = vld [vmem:[#allocation5 + $0x278] sm:$0xff]  ;;  %v203_v0 = vld [vmem:[#allocation5 + $0x270] sm:$0xff] }
  0x1f   :  { %103 = vmatpush.msra.mxu1 %v82_v12  ;;  %139 = vmatpush.msra.mxu2 %v124_v25  ;;  %v202_v1 = vld [vmem:[#allocation5 + $0x268] sm:$0xff]  ;;  %v201_v2 = vld [vmem:[#allocation5 + $0x260] sm:$0xff]  ;;  %v200_v3 = vld [vmem:[#allocation5 + $0x258] sm:$0xff] }
  0x20   :  { %176 = vmatpush.msra.mxu3 %v165_v43  ;;  %210 = vmatpush.msrb.mxu0 %v207_v60  ;;  %v199_v4 = vld [vmem:[#allocation5 + $0x250] sm:$0xff]  ;;  %v198_v5 = vld [vmem:[#allocation5 + $0x248] sm:$0xff]  ;;  %v197_v6 = vld [vmem:[#allocation5 + $0x240] sm:$0xff] }
  0x21   :  { %104 = vmatpush.msra.mxu1 %v81_v13  ;;  %140 = vmatpush.msra.mxu2 %v123_v26  ;;  %v196_v7 = vld [vmem:[#allocation5 + $0x238] sm:$0xff]  ;;  %v296_v8 = vld [vmem:[#allocation5 + $0x190] ss:$0 sm:$0xff]  ;;  %v194_v13 = vld [vmem:[#allocation5 + $0x228] sm:$0xff] }
  0x22   :  { %177 = vmatpush.msra.mxu3 %v164_v44  ;;  %211 = vmatpush.msrb.mxu0 %v206_v61  ;;  %v195_v12 = vld [vmem:[#allocation5 + $0x230] sm:$0xff]  ;;  %v241_v19 = vld [vmem:[#allocation5 + $0x2f8] sm:$0xff]  ;;  %v239_v21 = vld [vmem:[#allocation5 + $0x2e8] sm:$0xff] }
  0x23   :  { %105 = vmatpush.msra.mxu1 %v80_v14  ;;  %141 = vmatpush.msra.mxu2 %v122_v27  ;;  %v193_v14 = vld [vmem:[#allocation5 + $0x220] sm:$0xff]  ;;  %v240_v20 = vld [vmem:[#allocation5 + $0x2f0] sm:$0xff]  ;;  %v237_v23 = vld [vmem:[#allocation5 + $0x2d8] sm:$0xff] }
  0x24   :  { %178 = vmatpush.msra.mxu3 %v163_v45  ;;  %212 = vmatpush.msrb.mxu0 %v205_v62  ;;  %v238_v22 = vld [vmem:[#allocation5 + $0x2e0] sm:$0xff]  ;;  %v236_v24 = vld [vmem:[#allocation5 + $0x2d0] sm:$0xff]  ;;  %v235_v25 = vld [vmem:[#allocation5 + $0x2c8] sm:$0xff] }
  0x25   :  { %106 = vmatpush.msra.mxu1 %v79_v15  ;;  %142 = vmatpush.msra.mxu2 %v121_v28  ;;  %v245_v15 = vld [vmem:[#allocation5 + $0x318] sm:$0xff]  ;;  %v234_v26 = vld [vmem:[#allocation5 + $0x2c0] sm:$0xff] }
  0x26   :  { %179 = vmatpush.msra.mxu3 %v162_v46  ;;  %213 = vmatpush.msrb.mxu0 %v204_v63  ;;  %v233_v27 = vld [vmem:[#allocation5 + $0x2b8] sm:$0xff] }
  0x27   :  { %107 = vmatpush.msra.mxu1 %v78_v16  ;;  %143 = vmatpush.msra.mxu2 %v120_v29  ;;  %v244_v16 = vld [vmem:[#allocation5 + $0x310] sm:$0xff]  ;;  %v297_v28 = vld [vmem:[#allocation5 + $0x218] ss:$0 sm:$0xff] }
  0x28   :  { %180 = vmatpush.msra.mxu3 %v161_v47  ;;  %214 = vmatpush.msrb.mxu0 %v203_v0  ;;  %v232_v29 = vld [vmem:[#allocation5 + $0x2b0] sm:$0xff] }
  0x29   :  { %108 = vmatpush.msra.mxu1 %v77_v17  ;;  %144 = vmatpush.msra.mxu2 %v119_v30  ;;  %v243_v17 = vld [vmem:[#allocation5 + $0x308] sm:$0xff] }
  0x2a   :  { %181 = vmatpush.msra.mxu3 %v160_v48  ;;  %215 = vmatpush.msrb.mxu0 %v202_v1 }
  0x2b   :  { %109 = vmatpush.msra.mxu1 %v76_v18  ;;  %145 = vmatpush.msra.mxu2 %v118_v31  ;;  %v242_v18 = vld [vmem:[#allocation5 + $0x300] sm:$0xff] }
  0x2c   :  { %182 = vmatpush.msra.mxu3 %v159_v49  ;;  %216 = vmatpush.msrb.mxu0 %v201_v2 }
  0x2d   :  { %146 = vmatpush.msra.mxu2 %v117_v36  ;;  %248 = vmatpush.msrb.mxu1 %v245_v15 }
  0x2e   :  { %183 = vmatpush.msra.mxu3 %v158_v50  ;;  %217 = vmatpush.msrb.mxu0 %v200_v3 }
  0x2f   :  { %147 = vmatpush.msra.mxu2 %v116_v37  ;;  %249 = vmatpush.msrb.mxu1 %v244_v16  ;;  %v298_v37 = vld [vmem:[#allocation5 + $0x320] ss:$0 sm:$0xff] }
  0x30   :  { %184 = vmatpush.msra.mxu3 %v157_v51  ;;  %218 = vmatpush.msrb.mxu0 %v199_v4 }
  0x31   :  { %148 = vmatpush.msra.mxu2 %v115_v38  ;;  %250 = vmatpush.msrb.mxu1 %v243_v17 }
  0x32   :  { %185 = vmatpush.msra.mxu3 %v156_v56  ;;  %219 = vmatpush.msrb.mxu0 %v198_v5 }
  0x33   :  { %251 = vmatpush.msrb.mxu1 %v242_v18 }
  0x34   :  { %186 = vmatpush.msra.mxu3 %v155_v57  ;;  %220 = vmatpush.msrb.mxu0 %v197_v6 }
  0x35   :  { %252 = vmatpush.msrb.mxu1 %v241_v19 }
  0x36   :  { %187 = vmatpush.msra.mxu3 %v154_v58  ;;  %221 = vmatpush.msrb.mxu0 %v196_v7 }
  0x37   :  { %253 = vmatpush.msrb.mxu1 %v240_v20 }
  0x38   :  { %222 = vmatpush.msrb.mxu0 %v195_v12 }
  0x39   :  { %254 = vmatpush.msrb.mxu1 %v239_v21 }
  0x3a   :  { %223 = vmatpush.msrb.mxu0 %v194_v13 }
  0x3b   :  { %255 = vmatpush.msrb.mxu1 %v238_v22 }
  0x3c   :  { %224 = vmatpush.msrb.mxu0 %v193_v14 }
  0x3d   :  { %256 = vmatpush.msrb.mxu1 %v237_v23 }
  0x3f   :  { %257 = vmatpush.msrb.mxu1 %v236_v24 }
  0x41   :  { %258 = vmatpush.msrb.mxu1 %v235_v25 }
  0x43   :  { %259 = vmatpush.msrb.mxu1 %v234_v26 }
  0x45   :  { %260 = vmatpush.msrb.mxu1 %v233_v27 }
  0x47   :  { %261 = vmatpush.msrb.mxu1 %v232_v29 }
  0x8c   :  { %v72_v33 = vpop.f32.mrf.mxu0 }
  0x8d   :  { %v73_v34 = vadd.f32 %v294_v32, %v72_v33  ;;  %v231_v33 = vld [vmem:[#allocation5 + $0x2a8] sm:$0xff] }
  0x8e   :  { %262 = vmatpush.msrb.mxu1 %v231_v33 }
  0x8f   :  { %v75_v35 = vmax.f32 %v73_v34, 0.0  ;;  %v230_v34 = vld [vmem:[#allocation5 + $0x2a0] sm:$0xff] }
  0x90   :  { %263 = vmatpush.msrb.mxu1 %v230_v34 }
  0x91   :  { %110 = vmatmul.f32.vlgmr.msra.gmra.mxu1 %v75_v35 }
 0x10e   :  { %v111_v53 = vpop.f32.mrf.mxu1 }
 0x10f   :  { %v112_v54 = vadd.f32 %v295_v52, %v111_v53 }
 0x111   :  { %v114_v55 = vmax.f32 %v112_v54, 0.0 }
 0x113   :  { %149 = vmatmul.f32.vlgmr.msra.gmra.mxu2 %v114_v55 }
 0x196   :  { %v150_v9 = vpop.f32.mrf.mxu2 }
 0x197   :  { %v151_v10 = vadd.f32 %v296_v8, %v150_v9 }
 0x199   :  { %v153_v11 = vmax.f32 %v151_v10, 0.0 }
 0x19b   :  { %188 = vmatmul.f32.vlgmr.msra.gmra.mxu3 %v153_v11 }
 0x21e   :  { %v189_v30 = vpop.f32.mrf.mxu3 }
 0x21f   :  { %v190_v31 = vadd.f32 %v297_v28, %v189_v30 }
 0x221   :  { %v192_v32 = vmax.f32 %v190_v31, 0.0 }
 0x223   :  { %225 = vmatmul.f32.vlgmr.msrb.gmra.mxu0 %v192_v32 }
 0x2a0   :  { %v226_v35 = vpop.f32.mrf.mxu0 }
 0x2a1   :  { %v229_v36 = vmax.f32 %v226_v35, 0.0 }
 0x2a3   :  { %264 = vmatmul.f32.vlgmr.msrb.gmra.mxu1 %v229_v36 }
 0x320   :  { %v265_v38 = vpop.f32.mrf.mxu1 }
 0x321   :  { %v266_v39 = vadd.f32 %v298_v37, %v265_v38 }
 0x323   :  { %268 = vst [vmem:[#allocation7] sm:$0xff] %v266_v39 }
 0x324   :  { %279 = dma.vmem_to_hbm [thread:$0]  %s275_s1, 128, %s277_s23, [#allocation4]  }
 0x325   :  { %375 = dma.done.wait [#allocation4], 128  }
 0x326   :  { %376 = vsyncadd [#allocation4], 4294967168 }
 0x327   :  { %284 = vsyncpa [#allocation3], 1 }
 0x328   :  { %285 = vsyncpa [#allocation6], 1 }
 0x329   :  { %286 = vsyncpa [#allocation4], 1 }

</bundles_post_ra>
